<compile_context>
chip_gen: v6e
topology: v6e:2x2x1
jax: 0.10.0
libtpu: 0.0.40
codegen_flags: <defaults>
</compile_context>

<pallas_src>
import jax
import jax.numpy as jnp
from jax import lax
from jax.experimental import pallas as pl
from jax.experimental.pallas import tpu as pltpu


# ---------------------------------------------------------------------------
# Fused kernel: param recovery + policy step in one launch (small batches).
# ---------------------------------------------------------------------------
def _fused_forward_kernel(scalars_ref, state_ref, q_ref, w_rec_ref, b_ref,
                          b_rec_ref, out_ref):
    scale = scalars_ref[0]
    vmax = scalars_ref[1]
    vmin = scalars_ref[2]

    # --- state-independent path (cheap; B is tiny on this code path) ---
    q = q_ref[...]                                                 # (A, H)
    w_plus = jnp.dot(q * q, w_rec_ref[...],
                     preferred_element_type=jnp.float32)           # (A, H)

    bq = jnp.maximum(b_ref[...], 0.0)                              # (1, H)
    # b >= 0 so sum(b) == ||b||_1; exact divide (no approx reciprocal).
    bq = (scale / jnp.maximum(jnp.sum(bq), 1e-30)) * bq
    base = jnp.dot(-bq, b_rec_ref[...],
                   preferred_element_type=jnp.float32)             # (1, H)
    b_plus = base - (vmax - 0.02)
    b_minus = base + (vmin + 0.02)

    # --- state-dependent path ---
    s = state_ref[...]                                             # (B, 1)
    # out = relu(s+b_plus) @ w_plus.T + relu(-s+b_minus) @ (-w_plus).T
    #     = (relu(s+b_plus) - relu(-s+b_minus)) @ w_plus.T
    diff = jnp.maximum(s + b_plus, 0.0) - jnp.maximum(-s + b_minus, 0.0)
    out = lax.dot_general(diff, w_plus,
                          dimension_numbers=(((1,), (1,)), ((), ())),
                          preferred_element_type=jnp.float32)      # (B, A)
    out_ref[...] = out.astype(out_ref.dtype)


def _fused_forward(state, q, w_recover, b_row, b_recover, scalars):
    B = state.shape[0]
    A, H = q.shape
    full = lambda shp: pl.BlockSpec(shp, lambda i: tuple(0 for _ in shp))
    return pl.pallas_call(
        _fused_forward_kernel,
        out_shape=jax.ShapeDtypeStruct((B, A), jnp.float32),
        grid=(1,),
        in_specs=[
            pl.BlockSpec(memory_space=pltpu.MemorySpace.SMEM),     # (3,) scalars
            full((B, 1)),                                          # state
            full((A, H)),                                          # q
            full((H, H)),                                          # w_recover
            full((1, H)),                                          # b
            full((H, H)),                                          # b_recover
        ],
        out_specs=full((B, A)),
    )(scalars, state, q, w_recover, b_row, b_recover)


# ---------------------------------------------------------------------------
# Kernel 1 (split path): state-independent parameter recovery.
# Emits exactly the layout/dtype the step kernel consumes.
# ---------------------------------------------------------------------------
def _param_recover_kernel(scalars_ref, q_ref, w_rec_ref, b_ref, b_rec_t_ref,
                          w_plus_ref, b_plus_ref, b_minus_ref):
    scale = scalars_ref[0]
    vmax = scalars_ref[1]
    vmin = scalars_ref[2]

    # w_plus = q**2 @ w_recover (rows A..A_pad-1 of q are zero-padded by the
    # wrapper, so the padded output rows are exactly zero).  Cast once here
    # to the MXU operand dtype so the per-step kernel never converts.
    q = q_ref[...]                                                 # (A_pad, H)
    w_plus_ref[...] = jnp.dot(q * q, w_rec_ref[...],
                              preferred_element_type=jnp.float32
                              ).astype(w_plus_ref.dtype)

    # b -> clamp(>=0) -> L1 normalize (exact divide) -> * scale, as a column.
    bq = jnp.maximum(b_ref[...], 0.0)                              # (H, 1)
    bq = (scale / jnp.maximum(jnp.sum(bq), 1e-30)) * bq

    # base_t = (-b @ b_recover)^T = b_recover^T @ (-b_col); the wrapper passes
    # b_recover already transposed so this is a plain canonical matmul.
    base_t = jnp.dot(b_rec_t_ref[...], -bq,
                     preferred_element_type=jnp.float32)           # (H, 1)
    b_plus_ref[...] = base_t - (vmax - 0.02)
    b_minus_ref[...] = base_t + (vmin + 0.02)


def recover_params(q, w_recover, b, b_recover, *, scale, vmax, vmin,
                   mxu_dtype=jnp.bfloat16):
    """Runs once per parameter update; outputs are cacheable across steps."""
    q = jnp.asarray(q, jnp.float32)
    A, H = q.shape
    a_pad = ((A + 7) // 8) * 8        # pad action dim to a sublane multiple
    q_pad = jnp.pad(q, ((0, a_pad - A), (0, 0)))
    b_col = jnp.asarray(b, jnp.float32).reshape(H, 1)
    b_rec_t = jnp.asarray(b_recover, jnp.float32).T
    w_rec = jnp.asarray(w_recover, jnp.float32)
    # Runtime SMEM scalars -> one compiled kernel for any scale/vmax/vmin.
    scalars = jnp.asarray([scale, vmax, vmin], jnp.float32)

    full = lambda shp: pl.BlockSpec(shp, lambda i: tuple(0 for _ in shp))
    return pl.pallas_call(
        _param_recover_kernel,
        out_shape=(jax.ShapeDtypeStruct((a_pad, H), mxu_dtype),   # w_plus_pad
                   jax.ShapeDtypeStruct((H, 1), jnp.float32),     # b_plus_t
                   jax.ShapeDtypeStruct((H, 1), jnp.float32)),    # b_minus_t
        grid=(1,),
        in_specs=[
            pl.BlockSpec(memory_space=pltpu.MemorySpace.SMEM),    # (3,) scalars
            full((a_pad, H)),
            full((H, H)),
            full((H, 1)),
            full((H, H)),
        ],
        out_specs=(full((a_pad, H)), full((H, 1)), full((H, 1))),
    )(scalars, q_pad, w_rec, b_col, b_rec_t)


# ---------------------------------------------------------------------------
# Kernel 2 (split path): per-step policy evaluation, batch on the lane axis.
# ---------------------------------------------------------------------------
def _policy_step_kernel(state_ref, w_plus_ref, b_plus_ref, b_minus_ref,
                        out_ref):
    s = state_ref[...]                                             # (1, TB) f32
    b_plus = b_plus_ref[...]                                       # (H, 1) f32
    b_minus = b_minus_ref[...]                                     # (H, 1) f32
    H = b_plus.shape[0]
    TB = s.shape[1]

    # Lane-dense row broadcast over the H=32 sublanes (stride-0, ~free);
    # the small (H,1) bias columns broadcast over lanes once per tile.
    s_b = jnp.broadcast_to(s, (H, TB))
    bp = jnp.broadcast_to(b_plus, (H, TB))
    bm = jnp.broadcast_to(b_minus, (H, TB))
    diff = jnp.maximum(s_b + bp, 0.0) - jnp.maximum(bm - s_b, 0.0)  # (H, TB)

    # out = w_plus @ diff : plain (A_pad,H)@(H,TB) MXU op, N streamed on lanes,
    # bf16 operands / f32 accumulate (w_plus was pre-cast in kernel 1).
    out = jnp.dot(w_plus_ref[...], diff.astype(w_plus_ref.dtype),
                  preferred_element_type=jnp.float32)               # (A_pad, TB)
    out_ref[...] = out.astype(out_ref.dtype)


def policy_step(state_row, w_plus_pad, b_plus_t, b_minus_t, *,
                batch_tile=4096):
    """state_row: (1, B) float32 (batch on lanes). Returns (A_pad, B) f32."""
    _, B = state_row.shape
    a_pad, H = w_plus_pad.shape

    if B <= batch_tile:
        tb, nb, Bp, state_p = B, 1, B, state_row
    else:
        assert batch_tile % 128 == 0, "batch_tile must be a multiple of 128"
        tb = batch_tile
        nb = pl.cdiv(B, tb)
        Bp = nb * tb
        state_p = jnp.pad(state_row, ((0, 0), (0, Bp - B)))

    out_t = pl.pallas_call(
        _policy_step_kernel,
        out_shape=jax.ShapeDtypeStruct((a_pad, Bp), jnp.float32),
        grid=(nb,),
        in_specs=[
            pl.BlockSpec((1, tb), lambda i: (0, i)),       # state tile (lanes)
            pl.BlockSpec((a_pad, H), lambda i: (0, 0)),    # grid-invariant
            pl.BlockSpec((H, 1), lambda i: (0, 0)),
            pl.BlockSpec((H, 1), lambda i: (0, 0)),
        ],
        out_specs=pl.BlockSpec((a_pad, tb), lambda i: (0, i)),
        compiler_params=pltpu.CompilerParams(
            dimension_semantics=("parallel",)),
        # TODO(synk): use pltpu.CORE_PARALLEL here on v7x when per-TC work
        # exceeds a few microseconds (large B); "parallel" is the portable
        # default for single-TC v5e/v6e.
    )(state_p, w_plus_pad, b_plus_t, b_minus_t)
    return out_t[:, :B]


# ---------------------------------------------------------------------------
# Public forward.
# ---------------------------------------------------------------------------
def safe_policy_forward(state, q, w_recover, b, b_recover, *, scale, vmax,
                        vmin, fused_batch_max=512, batch_tile=4096,
                        mxu_dtype=jnp.bfloat16):
    """Forward pass of SafePolicyNetwork.

    Callers that run many steps with fixed parameters should call
    `recover_params` once and `policy_step` per step instead (this wrapper
    recomputes the state-independent path on every call, matching the
    PyTorch forward's behaviour).
    """
    state = jnp.asarray(state, jnp.float32)
    assert state.ndim == 2 and state.shape[1] == 1, (
        "state must be (B, 1): `state @ select_w` with select_w=(1,H) implies "
        "a scalar observation")
    q = jnp.asarray(q, jnp.float32)
    B = state.shape[0]
    A, H = q.shape
    b_row = jnp.asarray(b, jnp.float32).reshape(1, H)

    if B <= fused_batch_max:
        scalars = jnp.asarray([scale, vmax, vmin], jnp.float32)
        return _fused_forward(state, q, jnp.asarray(w_recover, jnp.float32),
                              b_row, jnp.asarray(b_recover, jnp.float32),
                              scalars)

    # Large batch: hoist state-independent path, lane-dense step kernel.
    w_plus_pad, b_plus_t, b_minus_t = recover_params(
        q, w_recover, b_row, b_recover,
        scale=scale, vmax=vmax, vmin=vmin, mxu_dtype=mxu_dtype)
    out_t = policy_step(state.reshape(1, B), w_plus_pad, b_plus_t, b_minus_t,
                        batch_tile=batch_tile)                     # (A_pad, B)
    return out_t[:A, :].T                                          # (B, A)


# ---------------------------------------------------------------------------
# Pure-JAX reference (faithful transcription of the PyTorch forward).
# ---------------------------------------------------------------------------
def _reference_forward(state, q, w_recover, b, b_recover, scale, vmax, vmin):
    hp = lax.Precision.HIGHEST
    w_plus = jnp.matmul(jnp.square(q), w_recover, precision=hp)
    w_minus = -w_plus
    bb = jnp.maximum(b, 0.0)
    bb = scale * bb / jnp.sum(jnp.abs(bb))
    base = jnp.matmul(-bb, b_recover, precision=hp)
    b_plus = base - (vmax - 0.02)
    b_minus = base + (vmin + 0.02)
    H = q.shape[1]
    sel = jnp.ones((1, H), jnp.float32)
    nl_plus = jnp.matmul(jax.nn.relu(state @ sel + b_plus.reshape(1, H)),
                         w_plus.T, precision=hp)
    nl_minus = jnp.matmul(jax.nn.relu(state @ (-sel) + b_minus.reshape(1, H)),
                          w_minus.T, precision=hp)
    return nl_plus + nl_minus


if __name__ == "__main__":
    # Small, module-consistent shapes.
    B = 2            # batch (inference / get_action sized)
    obs_dim = 1      # state @ select_w(1,H) implies a scalar observation
    action_dim = 4
    hidden_dim = 32
    scale = 0.15
    vmax, vmin = 1.05, 0.95   # synthetic env bounds (env.vmax / env.vmin)

    key = jax.random.PRNGKey(0)
    k_state, k_state2, k_b, k_q = jax.random.split(key, 4)

    # Deterministic parameter init mirroring __init__ (torch.rand ~ U[0,1)).
    b = jax.random.uniform(k_b, (hidden_dim,), jnp.float32)
    b = b / jnp.sum(b) * scale
    q = jax.random.uniform(k_q, (action_dim, hidden_dim), jnp.float32)
    # TODO(synk): self.c and self.z are defined in __init__ but unused in
    # forward(); the in-place renormalisation of self.b.data / self.c.data is
    # a training-side mutation and is intentionally not reproduced.

    ones_hh = jnp.ones((hidden_dim, hidden_dim), jnp.float32)
    eye_h = jnp.eye(hidden_dim, dtype=jnp.float32)
    w_recover = -jnp.triu(ones_hh, k=0) + jnp.triu(ones_hh, k=2) + 2.0 * eye_h
    b_recover = jnp.triu(ones_hh, k=0) - eye_h
    b2d = b.reshape(1, hidden_dim)

    # ---- 1) small-batch fused path (single pallas_call, f32) -----------------
    state = jax.random.normal(k_state, (B, obs_dim), jnp.float32)
    out = safe_policy_forward(state, q, w_recover, b2d, b_recover,
                              scale=scale, vmax=vmax, vmin=vmin)
    out = jax.block_until_ready(out)
    ref = _reference_forward(state, q, w_recover, b, b_recover,
                             scale, vmax, vmin)
    assert out.shape == (B, action_dim)
    assert jnp.allclose(out, ref, atol=2e-4, rtol=2e-4), (out, ref)

    # ---- 2) large-batch split path (lane-dense transposed layout) ------------
    # B2=640 with a 256-lane batch tile exercises multiple grid steps plus the
    # pad-to-tile / slice-back edge handling.
    B2 = 640
    state2 = jax.random.normal(k_state2, (B2, obs_dim), jnp.float32)
    ref2 = _reference_forward(state2, q, w_recover, b, b_recover,
                              scale, vmax, vmin)

    # 2a. f32 MXU operands: bit-for-bit structural check at tight tolerance.
    out2_f32 = safe_policy_forward(state2, q, w_recover, b2d, b_recover,
                                   scale=scale, vmax=vmax, vmin=vmin,
                                   batch_tile=256, mxu_dtype=jnp.float32)
    out2_f32 = jax.block_until_ready(out2_f32)
    assert out2_f32.shape == (B2, action_dim)
    assert jnp.allclose(out2_f32, ref2, atol=2e-4, rtol=2e-4)

    # 2b. default bf16 MXU operands (f32 accumulate): looser tolerance covers
    #     the bf16 rounding of the two matmul operands.
    out2_bf16 = safe_policy_forward(state2, q, w_recover, b2d, b_recover,
                                    scale=scale, vmax=vmax, vmin=vmin,
                                    batch_tile=256)
    out2_bf16 = jax.block_until_ready(out2_bf16)
    assert out2_bf16.shape == (B2, action_dim)
    assert jnp.allclose(out2_bf16, ref2, atol=5e-2, rtol=5e-2)

    print("KERNEL_OK")
</pallas_src>

<mosaic_0001>
module attributes {stable_mosaic.version = 11 : i64} {
  func.func @_fused_forward_kernel(%arg0: i32, %arg1: memref<3xf32, #tpu.memory_space<smem>>, %arg2: memref<2x1xf32, #tpu.memory_space<vmem>>, %arg3: memref<4x32xf32, #tpu.memory_space<vmem>>, %arg4: memref<32x32xf32, #tpu.memory_space<vmem>>, %arg5: memref<1x32xf32, #tpu.memory_space<vmem>>, %arg6: memref<32x32xf32, #tpu.memory_space<vmem>>, %arg7: memref<2x4xf32, #tpu.memory_space<vmem>>) attributes {dimension_semantics = [#tpu.dimension_semantics<arbitrary>], iteration_bounds = array<i64: 1>, scalar_prefetch = 0 : i64, scratch_operands = 0 : i64, tpu.core_type = #tpu.core_type<tc>, window_params = [{transform_indices = @transform_0, window_bounds = array<i64: 3>}, {pipeline_mode = #tpu.pipeline_mode<synchronous>, transform_indices = @transform_1, window_bounds = array<i64: 2, 1>}, {pipeline_mode = #tpu.pipeline_mode<synchronous>, transform_indices = @transform_2, window_bounds = array<i64: 4, 32>}, {pipeline_mode = #tpu.pipeline_mode<synchronous>, transform_indices = @transform_3, window_bounds = array<i64: 32, 32>}, {pipeline_mode = #tpu.pipeline_mode<synchronous>, transform_indices = @transform_4, window_bounds = array<i64: 1, 32>}, {pipeline_mode = #tpu.pipeline_mode<synchronous>, transform_indices = @transform_5, window_bounds = array<i64: 32, 32>}, {pipeline_mode = #tpu.pipeline_mode<synchronous>, transform_indices = @transform_6, window_bounds = array<i64: 2, 4>}]} {
    %c0 = arith.constant 0 : index
    %0 = memref.load %arg1[%c0] : memref<3xf32, #tpu.memory_space<smem>>
    %c1 = arith.constant 1 : index
    %1 = memref.load %arg1[%c1] : memref<3xf32, #tpu.memory_space<smem>>
    %c2 = arith.constant 2 : index
    %2 = memref.load %arg1[%c2] : memref<3xf32, #tpu.memory_space<smem>>
    %c0_0 = arith.constant 0 : index
    %c0_1 = arith.constant 0 : index
    %3 = vector.load %arg3[%c0_0, %c0_1] : memref<4x32xf32, #tpu.memory_space<vmem>>, vector<4x32xf32>
    %4 = arith.mulf %3, %3 : vector<4x32xf32>
    %c0_2 = arith.constant 0 : index
    %c0_3 = arith.constant 0 : index
    %5 = vector.load %arg4[%c0_2, %c0_3] : memref<32x32xf32, #tpu.memory_space<vmem>>, vector<32x32xf32>
    %cst = arith.constant dense<0.000000e+00> : vector<4x32xf32>
    %6 = tpu.matmul %4, %5, %cst {dimension_numbers = #tpu.dot_dimension_numbers<[1], [0], [0], [1], [0, 0, 1, 1], [], []>} : vector<4x32xf32>, vector<32x32xf32>, vector<4x32xf32> -> vector<4x32xf32>
    %c0_4 = arith.constant 0 : index
    %c0_5 = arith.constant 0 : index
    %7 = vector.load %arg5[%c0_4, %c0_5] : memref<1x32xf32, #tpu.memory_space<vmem>>, vector<1x32xf32>
    %cst_6 = arith.constant 0.000000e+00 : f32
    %8 = vector.broadcast %cst_6 : f32 to vector<1x32xf32>
    %9 = arith.maximumf %7, %8 : vector<1x32xf32>
    %10 = vector.shape_cast %9 : vector<1x32xf32> to vector<1x1x32xf32>
    %cst_7 = arith.constant dense<0.000000e+00> : vector<1xf32>
    %11 = vector.multi_reduction <add>, %10, %cst_7 [1, 2] : vector<1x1x32xf32> to vector<1xf32>
    %12 = vector.shape_cast %11 : vector<1xf32> to vector<1x1x1xf32>
    %13 = vector.extract %12[0, 0, 0] : f32 from vector<1x1x1xf32>
    %cst_8 = arith.constant 1.000000e-30 : f32
    %14 = arith.maximumf %13, %cst_8 : f32
    %15 = arith.divf %0, %14 : f32
    %16 = vector.broadcast %15 : f32 to vector<1x32xf32>
    %17 = arith.mulf %16, %9 : vector<1x32xf32>
    %cst_9 = arith.constant 0.000000e+00 : f32
    %18 = vector.broadcast %cst_9 : f32 to vector<1x32xf32>
    %19 = arith.subf %18, %17 : vector<1x32xf32>
    %c0_10 = arith.constant 0 : index
    %c0_11 = arith.constant 0 : index
    %20 = vector.load %arg6[%c0_10, %c0_11] : memref<32x32xf32, #tpu.memory_space<vmem>>, vector<32x32xf32>
    %cst_12 = arith.constant dense<0.000000e+00> : vector<1x32xf32>
    %21 = tpu.matmul %19, %20, %cst_12 {dimension_numbers = #tpu.dot_dimension_numbers<[1], [0], [0], [1], [0, 0, 1, 1], [], []>} : vector<1x32xf32>, vector<32x32xf32>, vector<1x32xf32> -> vector<1x32xf32>
    %cst_13 = arith.constant 2.000000e-02 : f32
    %22 = arith.subf %1, %cst_13 : f32
    %23 = vector.broadcast %22 : f32 to vector<1x32xf32>
    %24 = arith.subf %21, %23 : vector<1x32xf32>
    %cst_14 = arith.constant 2.000000e-02 : f32
    %25 = arith.addf %2, %cst_14 : f32
    %26 = vector.broadcast %25 : f32 to vector<1x32xf32>
    %27 = arith.addf %21, %26 : vector<1x32xf32>
    %c0_15 = arith.constant 0 : index
    %c0_16 = arith.constant 0 : index
    %28 = vector.load %arg2[%c0_15, %c0_16] : memref<2x1xf32, #tpu.memory_space<vmem>>, vector<2x1xf32>
    %29 = vector.broadcast %28 : vector<2x1xf32> to vector<2x32xf32>
    %30 = vector.broadcast %24 : vector<1x32xf32> to vector<2x32xf32>
    %31 = arith.addf %29, %30 : vector<2x32xf32>
    %cst_17 = arith.constant 0.000000e+00 : f32
    %32 = vector.broadcast %cst_17 : f32 to vector<2x32xf32>
    %33 = arith.maximumf %31, %32 : vector<2x32xf32>
    %cst_18 = arith.constant 0.000000e+00 : f32
    %34 = vector.broadcast %cst_18 : f32 to vector<2x1xf32>
    %35 = arith.subf %34, %28 : vector<2x1xf32>
    %36 = vector.broadcast %35 : vector<2x1xf32> to vector<2x32xf32>
    %37 = vector.broadcast %27 : vector<1x32xf32> to vector<2x32xf32>
    %38 = arith.addf %36, %37 : vector<2x32xf32>
    %cst_19 = arith.constant 0.000000e+00 : f32
    %39 = vector.broadcast %cst_19 : f32 to vector<2x32xf32>
    %40 = arith.maximumf %38, %39 : vector<2x32xf32>
    %41 = arith.subf %33, %40 : vector<2x32xf32>
    %cst_20 = arith.constant dense<0.000000e+00> : vector<2x4xf32>
    %42 = tpu.matmul %41, %6, %cst_20 {dimension_numbers = #tpu.dot_dimension_numbers<[1], [1], [0], [0], [0, 0, 1, 0], [], []>} : vector<2x32xf32>, vector<4x32xf32>, vector<2x4xf32> -> vector<2x4xf32>
    %c0_21 = arith.constant 0 : index
    %c0_22 = arith.constant 0 : index
    %43 = vector.load %arg7[%c0_21, %c0_22] : memref<2x4xf32, #tpu.memory_space<vmem>>, vector<2x4xf32>
    tpu.vector_store %arg7[%c0_21, %c0_22], %42 {strides = array<i32>} : memref<2x4xf32, #tpu.memory_space<vmem>>, vector<2x4xf32>,
    return
  }
  func.func @transform_0(%arg0: i32) -> i32 {
    %c0_i32 = arith.constant 0 : i32
    %c0_i32_0 = arith.constant 0 : i32
    return %c0_i32 : i32
  }
  func.func @transform_1(%arg0: i32) -> (i32, i32) {
    %c0_i32 = arith.constant 0 : i32
    %c0_i32_0 = arith.constant 0 : i32
    %c0_i32_1 = arith.constant 0 : i32
    return %c0_i32, %c0_i32_0 : i32, i32
  }
  func.func @transform_2(%arg0: i32) -> (i32, i32) {
    %c0_i32 = arith.constant 0 : i32
    %c0_i32_0 = arith.constant 0 : i32
    %c0_i32_1 = arith.constant 0 : i32
    return %c0_i32, %c0_i32_0 : i32, i32
  }
  func.func @transform_3(%arg0: i32) -> (i32, i32) {
    %c0_i32 = arith.constant 0 : i32
    %c0_i32_0 = arith.constant 0 : i32
    %c0_i32_1 = arith.constant 0 : i32
    return %c0_i32, %c0_i32_0 : i32, i32
  }
  func.func @transform_4(%arg0: i32) -> (i32, i32) {
    %c0_i32 = arith.constant 0 : i32
    %c0_i32_0 = arith.constant 0 : i32
    %c0_i32_1 = arith.constant 0 : i32
    return %c0_i32, %c0_i32_0 : i32, i32
  }
  func.func @transform_5(%arg0: i32) -> (i32, i32) {
    %c0_i32 = arith.constant 0 : i32
    %c0_i32_0 = arith.constant 0 : i32
    %c0_i32_1 = arith.constant 0 : i32
    return %c0_i32, %c0_i32_0 : i32, i32
  }
  func.func @transform_6(%arg0: i32) -> (i32, i32) {
    %c0_i32 = arith.constant 0 : i32
    %c0_i32_0 = arith.constant 0 : i32
    %c0_i32_1 = arith.constant 0 : i32
    return %c0_i32, %c0_i32_0 : i32, i32
  }
}

</mosaic_0001>

<bundles_post_ra>
// kernel: tpu_custom_call.1
= control target key start
LH: loop header
LB: loop body
LE: loop exit
PB: predicated region body
PF: predicated region fallthrough
CT: control target
= control target key end

     0   :  { %11 = vsyncpa [#allocation5], 0  ;;  %s596_s0 = inlined_call_operand.vmem [shape: f32[3], index: 0, kind: input, shape index: {}]   ;;  %s597_s1 = inlined_call_operand.vmem [shape: f32[2,1], index: 1, kind: input, shape index: {}]   ;;  %s598_s2 = inlined_call_operand.vmem [shape: f32[4,32], index: 2, kind: input, shape index: {}]   ;;  %s599_s3 = inlined_call_operand.hbm [shape: f32[32,32], index: 3, kind: input, shape index: {}]   ;;  %s600_s4 = inlined_call_operand.vmem [shape: f32[1,32], index: 4, kind: input, shape index: {}]   ;;  %s601_s5 = inlined_call_operand.hbm [shape: f32[32,32], index: 5, kind: input, shape index: {}]   ;;  %s602_s6 = inlined_call_operand.hbm [shape: f32[2,4], index: 6, kind: output, shape index: {}]  }
   0x1   :  { %12 = vsyncpa [#allocation3], 0 }
   0x2   :  { %13 = vsyncpa [#allocation8], 0 }
   0x3   :  { %14 = vsyncpa [#allocation4], 0  ;;  %s21_s23 = sshll.u32 %s596_s0, 4  ;;  %s22_s23 = int_to_ptr.vmem [resolvable:$true] %s21_s23 }
   0x4   :  { %s436_s24 = scalar_lea.vmem %s22_s23, 16  ;;  %p441_p1 = scmp.lt.s32.totalorder %s22_s23, %s22_s23 }
   0x5   :  { %p437_p0 = scmp.ne.s32.totalorder %s22_s23, %s436_s24  ;;  %p442_p2 = scmp.lt.s32.totalorder %s436_s24, %s436_s24 }
   0x7   :  { %p443_p3 = por %p442_p2, %p441_p1 }
   0x9   :  { %p444_p4 = pnand %p443_p3, %p437_p0 }
   0xb   :  { %447 = shalt.err (!%p444_p4)
}
   0xc   :  { %s516_s25 = smov [#allocation2]   ;;  %s517_s26 = smov [#allocation6]  }
   0xd   :  { %24 = dma.vmem_to_smem %s22_s23, 16, %s516_s25, [#allocation5]  }
   0xe   :  { %s34_s27 = sshll.u32 %s517_s26, 4  ;;  %s35_s27 = int_to_ptr.vmem [resolvable:$true] %s34_s27 }
   0xf   :  { %s456_s28 = scalar_lea.vmem %s35_s27, 512  ;;  %p461_p6 = scmp.lt.s32.totalorder %s35_s27, %s35_s27 }
  0x10   :  { %p457_p5 = scmp.ne.s32.totalorder %s35_s27, %s456_s28  ;;  %p462_p7 = scmp.lt.s32.totalorder %s456_s28, %s456_s28 }
  0x12   :  { %p463_p8 = por %p462_p7, %p461_p6 }
  0x14   :  { %p464_p9 = pnand %p463_p8, %p457_p5 }
  0x16   :  { %467 = shalt.err (!%p464_p9)
}
  0x17   :  { %s518_s0 = smov 128   ;;  %s519_s29 = smov 8  }
  0x18   :  { %40 = dma.hbm_to_vmem [thread:$0]  %s599_s3, 512, %s35_s27, [#allocation3], %s518_s0, %s518_s0, %s519_s29  }
  0x19   :  { %s520_s8 = smov [#allocation7]  }
  0x1a   :  { %s48_s9 = sshll.u32 %s520_s8, 4  ;;  %s49_s9 = int_to_ptr.vmem [resolvable:$true] %s48_s9 }
  0x1b   :  { %s476_s10 = scalar_lea.vmem %s49_s9, 512  ;;  %p481_p11 = scmp.lt.s32.totalorder %s49_s9, %s49_s9 }
  0x1c   :  { %p477_p10 = scmp.ne.s32.totalorder %s49_s9, %s476_s10  ;;  %p482_p12 = scmp.lt.s32.totalorder %s476_s10, %s476_s10 }
  0x1e   :  { %p483_p13 = por %p482_p12, %p481_p11 }
  0x20   :  { %p484_p0 = pnand %p483_p13, %p477_p10 }
  0x22   :  { %487 = shalt.err (!%p484_p0)
}
  0x23   :  { %54 = dma.hbm_to_vmem [thread:$0]  %s601_s5, 512, %s49_s9, [#allocation8], %s518_s0, %s518_s0, %s519_s29  }
  0x24   :  { %508 = dma.done.wait [#allocation5], 16  }
  0x25   :  { %509 = vsyncadd [#allocation5], 4294967280 }
  0x26   :  { %510 = dma.done.wait [#allocation3], 512  }
  0x27   :  { %511 = vsyncadd [#allocation3], 4294966784 }
  0x28   :  { %512 = dma.done.wait [#allocation8], 512  }
  0x29   :  { %513 = vsyncadd [#allocation8], 4294966784 }
  0x2a   :  { %64 = sfence }
  0x2b   :  { %v573_v0 = vld [vmem:[%s600_s4] sm:$0x1]  ;;  %vm150_vm0 = vcmask 253952   ;;  %v521_v4 = vmov 0.0   ;;  %v172_v5 = vld [vmem:[#allocation7 + $0x18] sm:$0xff]  ;;  %v171_v7 = vld [vmem:[#allocation7 + $0x10] sm:$0xff]  ;;  %v258_v31 = vlaneseq }
  0x2c   :  { %v149_v1 = vmax.f32 %v573_v0, 0.0  ;;  %402 = vmatprep.subr.mxu1 %v521_v4  ;;  %391 = vmatprep.subr.mxu0 %v521_v4  ;;  %v170_v9 = vld [vmem:[#allocation7 + $0x8] sm:$0xff]  ;;  %v73_v11 = vld [vmem:[#allocation6 + $0x18] sm:$0xff]  ;;  %v72_v12 = vld [vmem:[#allocation6 + $0x10] sm:$0xff]  ;;  %vm522_vm1 = vmmov 0   ;;  %v523_v21 = vmov 0  }
  0x2d   :  { %403 = vmatpush3.msra.mxu1 %v172_v5  ;;  %392 = vmatpush3.msra.mxu0 %v73_v11  ;;  %v169_v13 = vld [vmem:[#allocation7] sm:$0xff]  ;;  %v71_v15 = vld [vmem:[#allocation6 + $0x8] sm:$0xff]  ;;  %vm74_vm2 = vcmask 261120   ;;  %s524_s16 = smov 1e-30   ;;  %s65_s17 = sld [smem:[#allocation2]] }
  0x2e   :  { %v151_v2 = vsel %vm150_vm0, %v149_v1, 0.0  ;;  %404 = vmatprep.subr.mxu1 %v521_v4  ;;  %393 = vmatprep.subr.mxu0 %v521_v4  ;;  %v68_v16 = vld [vmem:[%s598_s2] sm:$0xf]  ;;  %s372_s20 = sld [smem:[#allocation2 + $0x1]]  ;;  %v259_v32 = vshrl.u32 %v258_v31, 7  ;;  %s525_s24 = smov [#allocation9]  }
  0x2f   :  { %152 = vadd.xlane.f32.xlu0 %v151_v2  ;;  %405 = vmatpush3.msra.mxu1 %v171_v7  ;;  %v70_v18 = vld [vmem:[#allocation6] sm:$0xff]  ;;  %v69_v19 = vmul.f32 %v68_v16, %v68_v16  ;;  %s373_s21 = sld [smem:[#allocation2 + $0x2]]  ;;  %s361_s25 = sshll.u32 %s525_s24, 4  ;;  %vm353_vm3 = vcmask 25600   ;;  %s362_s25 = int_to_ptr.vmem [resolvable:$true] %s361_s25 }
  0x30   :  { %406 = vmatprep.subr.mxu1 %v521_v4  ;;  %394 = vmatpush3.msra.mxu0 %v72_v12  ;;  %v252_v20 = vld [vmem:[%s597_s1] sm:$0x3]  ;;  %v260_v35 = vsub.s32 0, %v259_v32  ;;  %s488_s26 = scalar_lea.vmem %s362_s25, 32  ;;  %p493_p2 = scmp.lt.s32.totalorder %s362_s25, %s362_s25 }
  0x31   :  { %407 = vmatpush3.msra.mxu1 %v170_v9  ;;  %410 = vmatprep.mubr.msk.f32.mxu1 %vm522_vm1, %v521_v4  ;;  %v264_v22 = vsub.f32 0.0, %v252_v20  ;;  %p489_p1 = scmp.ne.s32.totalorder %s362_s25, %s488_s26  ;;  %p494_p3 = scmp.lt.s32.totalorder %s488_s26, %s488_s26 }
  0x32   :  { %408 = vmatprep.subr.mxu1 %v521_v4  ;;  %395 = vmatprep.subr.mxu0 %v521_v4 }
  0x33   :  { %409 = vmatpush3.msra.mxu1 %v169_v13  ;;  %399 = vmatprep.mubr.msk.f32.mxu0 %vm522_vm1, %v521_v4  ;;  %p495_p4 = por %p494_p3, %p493_p2 }
  0x34   :  { %396 = vmatpush3.msra.mxu0 %v71_v15  ;;  %433 = vset.pattern.permute.xlu1 %v523_v21  ;;  %s376_s22 = sadd.f32 -0.02, %s372_s20 }
  0x35   :  { %397 = vmatprep.subr.mxu0 %v521_v4  ;;  %432 = vset.pattern.permute.xlu0 %v523_v21  ;;  %s249_s23 = sadd.f32 0.02, %s373_s21  ;;  %p496_p5 = pnand %p495_p4, %p489_p1 }
  0x36   :  { %398 = vmatpush3.msra.mxu0 %v70_v18  ;;  %267 = vperm.xlu1 %433, %v264_v22   ;;  %v247_v33 = vstv %s376_s22 }
  0x37   :  { %400 = vmatmul.mubr.msk.f32.vlgmr.msra.gmra.mxu0 %vm74_vm2, %v69_v19  ;;  %413 = vmatprep.subr.mxu0 %v521_v4  ;;  %v250_v34 = vstv %s249_s23 }
  0x38   :  { %415 = vmatprep.mubr.msk.f32.mxu0 %vm522_vm1, %v521_v4 }
  0x45   :  { %255 = vperm.xlu0 %432, %v252_v20  }
  0xb1   :  { %v268_v39 = vpop.permute.xlu1 %267 }
  0xb8   :  { %v153_v3 = vpop.xlane.xlu0 %152 }
  0xb9   :  { %v154_v6 = vrot.slane %v153_v3, 4 }
  0xbb   :  { %v155_v8 = vadd.f32 %v154_v6, %v153_v3 }
  0xbd   :  { %v156_v10 = vrot.slane %v155_v8, 2 }
  0xbf   :  { %v157_v14 = vadd.f32 %v156_v10, %v155_v8 }
  0xc0   :  { %v256_v41 = vpop.permute.xlu0 %255 }
  0xc1   :  { %v158_v17 = vrot.slane %v157_v14, 1 }
  0xc3   :  { %v159_v23 = vadd.f32 %v158_v17, %v157_v14 }
  0xc5   :  { %418 = vpush %v159_v23 }
  0xf6   :  { %s419_s2 = spop %418 }
  0xf7   :  { %s161_s1 = smax.f32 %s524_s16, %s419_s2  ;;  %v144_v29 = vpop.f32.mrf.mxu0 }
  0xf8   :  { %v162_v24 = vstv %s161_s1  ;;  %414 = vmatpush3.xpose.msk.msra.mxu0 %vm74_vm2, %v144_v29 }
  0xf9   :  { %434 = vrcp.f32 %v162_v24  ;;  %v401_v30 = vpop.f32.mrf.mxu0 }
 0x106   :  { %v435_v25 = vpop.eup %434 }
 0x107   :  { %420 = vpush %v435_v25 }
 0x138   :  { %s421_s18 = spop %420 }
 0x139   :  { %s165_s19 = smul.f32 %s421_s18, %s65_s17 }
 0x13b   :  { %v166_v26 = vstv %s165_s19 }
 0x13c   :  { %v167_v27 = vmul.f32 %v166_v26, %v149_v1 }
 0x13e   :  { %v168_v28 = vsub.f32 0.0, %v167_v27 }
 0x140   :  { %411 = vmatmul.mubr.msk.f32.vlgmr.msra.gmra.mxu1 %vm74_vm2, %v168_v28 }
 0x200   :  { %v242_v36 = vpop.f32.mrf.mxu1 }
 0x201   :  { %v248_v37 = vsub.f32 %v242_v36, %v247_v33  ;;  %v251_v38 = vadd.f32 %v250_v34, %v242_v36 }
 0x202   :  { %v412_v40 = vpop.f32.mrf.mxu1 }
 0x203   :  { %v273_v42 = vrot.slane %v251_v38, %v260_v35  ;;  %v261_v43 = vrot.slane %v248_v37, %v260_v35 }
 0x205   :  { %v274_v44 = vadd.f32 %v273_v42, %v268_v39  ;;  %v262_v45 = vadd.f32 %v261_v43, %v256_v41 }
 0x207   :  { %v275_v46 = vmax.f32 %v274_v44, 0.0  ;;  %v263_v47 = vmax.f32 %v262_v45, 0.0 }
 0x209   :  { %v276_v48 = vsub.f32 %v263_v47, %v275_v46 }
 0x20b   :  { %416 = vmatmul.mubr.msk.f32.vlgmr.msra.gmra.mxu0 %vm74_vm2, %v276_v48 }
 0x2cb   :  { %v349_v49 = vpop.f32.mrf.mxu0 }
 0x2cc   :  { %354 = vst.msk [vmem:[#allocation9] sm:$0x3] %vm353_vm3, %v349_v49 }
 0x2cd   :  { %v417_v50 = vpop.f32.mrf.mxu0 }
 0x2ce   :  { %499 = shalt.err (!%p496_p5)
}
 0x2cf   :  { %364 = dma.vmem_to_hbm [thread:$0]  %s362_s25, 32, %s602_s6, [#allocation4]  }
 0x2d0   :  { %514 = dma.done.wait [#allocation4], 32  }
 0x2d1   :  { %515 = vsyncadd [#allocation4], 4294967264 }
 0x2d2   :  { %368 = vsyncpa [#allocation3], 1 }
 0x2d3   :  { %369 = vsyncpa [#allocation8], 1 }
 0x2d4   :  { %370 = vsyncpa [#allocation4], 1 }
 0x2d5   :  { %371 = vsyncpa [#allocation5], 1 }

</bundles_post_ra>
